<compile_context>
chip_gen: v5e
topology: v5e:2x2
jax: 0.10.0
libtpu: 0.0.40
codegen_flags: <defaults>
</compile_context>

<pallas_src>
import math
import jax
import jax.numpy as jnp
from jax.experimental import pallas as pl
from jax.experimental.pallas import tpu as pltpu


def mlp_kernel(x_ref,
               w1_ref, b1_ref,
               w2_ref, b2_ref,
               w3_ref, b3_ref,
               w4_ref, b4_ref,
               o_ref):
    # x_ref is (F, tile_b): features on sublanes, batch on lanes (lane-dense).
    h = x_ref[...]

    h = jnp.dot(w1_ref[...], h, preferred_element_type=jnp.float32) + b1_ref[...]
    h = jnp.maximum(h, 0.0)

    h = jnp.dot(w2_ref[...], h, preferred_element_type=jnp.float32) + b2_ref[...]
    h = jnp.maximum(h, 0.0)

    h = jnp.dot(w3_ref[...], h, preferred_element_type=jnp.float32) + b3_ref[...]
    h = jnp.maximum(h, 0.0)

    out = jnp.dot(w4_ref[...], h, preferred_element_type=jnp.float32) + b4_ref[...]
    o_ref[...] = out.astype(o_ref.dtype)


def mlp_forward(x, params, *, tile_b=32768):
    """x: (B, input_dim) f32.  params: list of (W, b) with W (out, in) [PyTorch layout],
    b (out, 1).  Returns (B, 2) f32."""
    B, F = x.shape
    out_dim = params[-1][0].shape[0]

    # Lane-aligned batch tile: multiple of 128, no larger than the lane-padded batch.
    tile_b = max(128, min(tile_b, pl.cdiv(B, 128) * 128))
    tile_b = (tile_b // 128) * 128
    grid = (pl.cdiv(B, tile_b),)

    # Feature-major view: (F, B) so the batch dim lands on lanes (dense DMAs / stores).
    x_t = x.T

    flat_args = [x_t]
    in_specs = [pl.BlockSpec((F, tile_b), lambda i: (0, i))]
    for w, b in params:
        flat_args += [w, b]
        # Full-array blocks with constant index_map -> resident in VMEM across steps.
        in_specs += [
            pl.BlockSpec(w.shape, lambda i: (0, 0)),
            pl.BlockSpec(b.shape, lambda i: (0, 0)),
        ]

    # Advisory cost estimate (memory-bound kernel: ~36 B/row HBM, ~6 KFLOP/row).
    flops = 2 * sum(w.shape[0] * w.shape[1] for w, _ in params) * B
    bytes_accessed = 4 * (x.size + B * out_dim
                          + sum(w.size + b.size for w, b in params))

    # Peak VMEM ~0.7 KiB per batch column (x + intermediates + double-buffered I/O);
    # clamp to [32 MiB, 56 MiB] so it fits v7x's 64 MiB while exceeding v5e's 16 MiB
    # default scoped limit.
    vmem_limit = min(max(32 << 20, 768 * tile_b + (16 << 20)), 56 << 20)

    out_t = pl.pallas_call(
        mlp_kernel,
        out_shape=jax.ShapeDtypeStruct((out_dim, B), jnp.float32),
        grid=grid,
        in_specs=in_specs,
        out_specs=pl.BlockSpec((out_dim, tile_b), lambda i: (0, i)),
        compiler_params=pltpu.CompilerParams(
            dimension_semantics=("parallel",),
            vmem_limit_bytes=vmem_limit,
        ),
        cost_estimate=pl.CostEstimate(
            flops=flops, transcendentals=0, bytes_accessed=bytes_accessed),
    )(*flat_args)

    return out_t.T  # (B, out_dim)


def init_mlp_params(key, input_dim=7):
    """Kaiming-normal weights (fan_in, gain=sqrt(2) for relu), zero biases.
    Weights kept in PyTorch-native (out, in) layout; biases as (out, 1)."""
    dims = [(input_dim, 64), (64, 32), (32, 16), (16, 2)]
    params = []
    for (fan_in, fan_out) in dims:
        key, sub = jax.random.split(key)
        std = math.sqrt(2.0 / fan_in)  # kaiming_normal_ with nonlinearity='relu'
        w = jax.random.normal(sub, (fan_out, fan_in), dtype=jnp.float32) * std
        b = jnp.zeros((fan_out, 1), dtype=jnp.float32)
        params.append((w, b))
    return params


def mlp_reference(x, params):
    h = x
    for i, (w, b) in enumerate(params):
        h = h @ w.T + b.T
        if i < len(params) - 1:
            h = jnp.maximum(h, 0.0)
    return h


if __name__ == "__main__":
    key = jax.random.PRNGKey(0)
    pkey, xkey, xkey2 = jax.random.split(key, 3)

    input_dim = 7
    params = init_mlp_params(pkey, input_dim=input_dim)

    # Small case: single grid step, batch smaller than one lane tile.
    batch = 8
    x = jax.random.normal(xkey, (batch, input_dim), dtype=jnp.float32)
    out = jax.block_until_ready(mlp_forward(x, params))
    ref = mlp_reference(x, params)
    assert out.shape == (batch, 2), out.shape
    assert jnp.allclose(out, ref, atol=1e-5, rtol=1e-5), "mismatch vs reference (B=8)"

    # Multi-step grid with a ragged last tile (exercises batch tiling / padding).
    batch2 = 421
    x2 = jax.random.normal(xkey2, (batch2, input_dim), dtype=jnp.float32)
    out2 = jax.block_until_ready(mlp_forward(x2, params, tile_b=128))
    ref2 = mlp_reference(x2, params)
    assert out2.shape == (batch2, 2), out2.shape
    assert jnp.allclose(out2, ref2, atol=1e-5, rtol=1e-5), "mismatch vs reference (B=421)"

    print("KERNEL_OK")
</pallas_src>

<mosaic_0001>
module attributes {stable_mosaic.version = 11 : i64} {
  func.func @mlp_kernel(%arg0: i32, %arg1: memref<7x128xf32, #tpu.memory_space<vmem>>, %arg2: memref<64x7xf32, #tpu.memory_space<vmem>>, %arg3: memref<64x1xf32, #tpu.memory_space<vmem>>, %arg4: memref<32x64xf32, #tpu.memory_space<vmem>>, %arg5: memref<32x1xf32, #tpu.memory_space<vmem>>, %arg6: memref<16x32xf32, #tpu.memory_space<vmem>>, %arg7: memref<16x1xf32, #tpu.memory_space<vmem>>, %arg8: memref<2x16xf32, #tpu.memory_space<vmem>>, %arg9: memref<2x1xf32, #tpu.memory_space<vmem>>, %arg10: memref<2x128xf32, #tpu.memory_space<vmem>>) attributes {dimension_semantics = [#tpu.dimension_semantics<parallel>], iteration_bounds = array<i64: 1>, scalar_prefetch = 0 : i64, scratch_operands = 0 : i64, tpu.core_type = #tpu.core_type<tc>, window_params = [{transform_indices = @transform_0, window_bounds = array<i64: 7, 128>}, {pipeline_mode = #tpu.pipeline_mode<synchronous>, transform_indices = @transform_1, window_bounds = array<i64: 64, 7>}, {pipeline_mode = #tpu.pipeline_mode<synchronous>, transform_indices = @transform_2, window_bounds = array<i64: 64, 1>}, {pipeline_mode = #tpu.pipeline_mode<synchronous>, transform_indices = @transform_3, window_bounds = array<i64: 32, 64>}, {pipeline_mode = #tpu.pipeline_mode<synchronous>, transform_indices = @transform_4, window_bounds = array<i64: 32, 1>}, {pipeline_mode = #tpu.pipeline_mode<synchronous>, transform_indices = @transform_5, window_bounds = array<i64: 16, 32>}, {pipeline_mode = #tpu.pipeline_mode<synchronous>, transform_indices = @transform_6, window_bounds = array<i64: 16, 1>}, {pipeline_mode = #tpu.pipeline_mode<synchronous>, transform_indices = @transform_7, window_bounds = array<i64: 2, 16>}, {pipeline_mode = #tpu.pipeline_mode<synchronous>, transform_indices = @transform_8, window_bounds = array<i64: 2, 1>}, {transform_indices = @transform_9, window_bounds = array<i64: 2, 128>}]} {
    %c0 = arith.constant 0 : index
    %c0_0 = arith.constant 0 : index
    %0 = vector.load %arg1[%c0, %c0_0] : memref<7x128xf32, #tpu.memory_space<vmem>>, vector<7x128xf32>
    %c0_1 = arith.constant 0 : index
    %c0_2 = arith.constant 0 : index
    %1 = vector.load %arg2[%c0_1, %c0_2] : memref<64x7xf32, #tpu.memory_space<vmem>>, vector<64x7xf32>
    %cst = arith.constant dense<0.000000e+00> : vector<64x128xf32>
    %2 = tpu.matmul %1, %0, %cst {dimension_numbers = #tpu.dot_dimension_numbers<[1], [0], [0], [1], [0, 0, 1, 1], [], []>} : vector<64x7xf32>, vector<7x128xf32>, vector<64x128xf32> -> vector<64x128xf32>
    %c0_3 = arith.constant 0 : index
    %c0_4 = arith.constant 0 : index
    %3 = vector.load %arg3[%c0_3, %c0_4] : memref<64x1xf32, #tpu.memory_space<vmem>>, vector<64x1xf32>
    %4 = vector.broadcast %3 : vector<64x1xf32> to vector<64x128xf32>
    %5 = arith.addf %2, %4 : vector<64x128xf32>
    %cst_5 = arith.constant 0.000000e+00 : f32
    %6 = vector.broadcast %cst_5 : f32 to vector<64x128xf32>
    %7 = arith.maximumf %5, %6 : vector<64x128xf32>
    %c0_6 = arith.constant 0 : index
    %c0_7 = arith.constant 0 : index
    %8 = vector.load %arg4[%c0_6, %c0_7] : memref<32x64xf32, #tpu.memory_space<vmem>>, vector<32x64xf32>
    %cst_8 = arith.constant dense<0.000000e+00> : vector<32x128xf32>
    %9 = tpu.matmul %8, %7, %cst_8 {dimension_numbers = #tpu.dot_dimension_numbers<[1], [0], [0], [1], [0, 0, 1, 1], [], []>} : vector<32x64xf32>, vector<64x128xf32>, vector<32x128xf32> -> vector<32x128xf32>
    %c0_9 = arith.constant 0 : index
    %c0_10 = arith.constant 0 : index
    %10 = vector.load %arg5[%c0_9, %c0_10] : memref<32x1xf32, #tpu.memory_space<vmem>>, vector<32x1xf32>
    %11 = vector.broadcast %10 : vector<32x1xf32> to vector<32x128xf32>
    %12 = arith.addf %9, %11 : vector<32x128xf32>
    %cst_11 = arith.constant 0.000000e+00 : f32
    %13 = vector.broadcast %cst_11 : f32 to vector<32x128xf32>
    %14 = arith.maximumf %12, %13 : vector<32x128xf32>
    %c0_12 = arith.constant 0 : index
    %c0_13 = arith.constant 0 : index
    %15 = vector.load %arg6[%c0_12, %c0_13] : memref<16x32xf32, #tpu.memory_space<vmem>>, vector<16x32xf32>
    %cst_14 = arith.constant dense<0.000000e+00> : vector<16x128xf32>
    %16 = tpu.matmul %15, %14, %cst_14 {dimension_numbers = #tpu.dot_dimension_numbers<[1], [0], [0], [1], [0, 0, 1, 1], [], []>} : vector<16x32xf32>, vector<32x128xf32>, vector<16x128xf32> -> vector<16x128xf32>
    %c0_15 = arith.constant 0 : index
    %c0_16 = arith.constant 0 : index
    %17 = vector.load %arg7[%c0_15, %c0_16] : memref<16x1xf32, #tpu.memory_space<vmem>>, vector<16x1xf32>
    %18 = vector.broadcast %17 : vector<16x1xf32> to vector<16x128xf32>
    %19 = arith.addf %16, %18 : vector<16x128xf32>
    %cst_17 = arith.constant 0.000000e+00 : f32
    %20 = vector.broadcast %cst_17 : f32 to vector<16x128xf32>
    %21 = arith.maximumf %19, %20 : vector<16x128xf32>
    %c0_18 = arith.constant 0 : index
    %c0_19 = arith.constant 0 : index
    %22 = vector.load %arg8[%c0_18, %c0_19] : memref<2x16xf32, #tpu.memory_space<vmem>>, vector<2x16xf32>
    %cst_20 = arith.constant dense<0.000000e+00> : vector<2x128xf32>
    %23 = tpu.matmul %22, %21, %cst_20 {dimension_numbers = #tpu.dot_dimension_numbers<[1], [0], [0], [1], [0, 0, 1, 1], [], []>} : vector<2x16xf32>, vector<16x128xf32>, vector<2x128xf32> -> vector<2x128xf32>
    %c0_21 = arith.constant 0 : index
    %c0_22 = arith.constant 0 : index
    %24 = vector.load %arg9[%c0_21, %c0_22] : memref<2x1xf32, #tpu.memory_space<vmem>>, vector<2x1xf32>
    %25 = vector.broadcast %24 : vector<2x1xf32> to vector<2x128xf32>
    %26 = arith.addf %23, %25 : vector<2x128xf32>
    %c0_23 = arith.constant 0 : index
    %c0_24 = arith.constant 0 : index
    %27 = vector.load %arg10[%c0_23, %c0_24] : memref<2x128xf32, #tpu.memory_space<vmem>>, vector<2x128xf32>
    tpu.vector_store %arg10[%c0_23, %c0_24], %26 {strides = array<i32>} : memref<2x128xf32, #tpu.memory_space<vmem>>, vector<2x128xf32>,
    return
  }
  func.func @transform_0(%arg0: i32) -> (i32, i32) {
    %c0_i32 = arith.constant 0 : i32
    %c0_i32_0 = arith.constant 0 : i32
    return %c0_i32, %arg0 : i32, i32
  }
  func.func @transform_1(%arg0: i32) -> (i32, i32) {
    %c0_i32 = arith.constant 0 : i32
    %c0_i32_0 = arith.constant 0 : i32
    %c0_i32_1 = arith.constant 0 : i32
    return %c0_i32, %c0_i32_0 : i32, i32
  }
  func.func @transform_2(%arg0: i32) -> (i32, i32) {
    %c0_i32 = arith.constant 0 : i32
    %c0_i32_0 = arith.constant 0 : i32
    %c0_i32_1 = arith.constant 0 : i32
    return %c0_i32, %c0_i32_0 : i32, i32
  }
  func.func @transform_3(%arg0: i32) -> (i32, i32) {
    %c0_i32 = arith.constant 0 : i32
    %c0_i32_0 = arith.constant 0 : i32
    %c0_i32_1 = arith.constant 0 : i32
    return %c0_i32, %c0_i32_0 : i32, i32
  }
  func.func @transform_4(%arg0: i32) -> (i32, i32) {
    %c0_i32 = arith.constant 0 : i32
    %c0_i32_0 = arith.constant 0 : i32
    %c0_i32_1 = arith.constant 0 : i32
    return %c0_i32, %c0_i32_0 : i32, i32
  }
  func.func @transform_5(%arg0: i32) -> (i32, i32) {
    %c0_i32 = arith.constant 0 : i32
    %c0_i32_0 = arith.constant 0 : i32
    %c0_i32_1 = arith.constant 0 : i32
    return %c0_i32, %c0_i32_0 : i32, i32
  }
  func.func @transform_6(%arg0: i32) -> (i32, i32) {
    %c0_i32 = arith.constant 0 : i32
    %c0_i32_0 = arith.constant 0 : i32
    %c0_i32_1 = arith.constant 0 : i32
    return %c0_i32, %c0_i32_0 : i32, i32
  }
  func.func @transform_7(%arg0: i32) -> (i32, i32) {
    %c0_i32 = arith.constant 0 : i32
    %c0_i32_0 = arith.constant 0 : i32
    %c0_i32_1 = arith.constant 0 : i32
    return %c0_i32, %c0_i32_0 : i32, i32
  }
  func.func @transform_8(%arg0: i32) -> (i32, i32) {
    %c0_i32 = arith.constant 0 : i32
    %c0_i32_0 = arith.constant 0 : i32
    %c0_i32_1 = arith.constant 0 : i32
    return %c0_i32, %c0_i32_0 : i32, i32
  }
  func.func @transform_9(%arg0: i32) -> (i32, i32) {
    %c0_i32 = arith.constant 0 : i32
    %c0_i32_0 = arith.constant 0 : i32
    return %c0_i32, %arg0 : i32, i32
  }
}

</mosaic_0001>

<bundles_post_ra>
// kernel: tpu_custom_call.1
= control target key start
LH: loop header
LB: loop body
LE: loop exit
PB: predicated region body
PF: predicated region fallthrough
CT: control target
= control target key end

     0   :  { %vm115_vm0 = vcmask 1046528   ;;  %v392_v3 = vmov 0   ;;  %vm90_vm1 = vcmask 56320   ;;  %s548_s0 = inlined_call_operand.vmem [shape: f32[7,8], index: 0, kind: input, shape index: {}]   ;;  %s549_s1 = inlined_call_operand.vmem [shape: f32[64,7], index: 1, kind: input, shape index: {}]   ;;  %s550_s2 = inlined_call_operand.vmem [shape: f32[64,1], index: 2, kind: input, shape index: {}]   ;;  %s551_s3 = inlined_call_operand.vmem [shape: f32[32,64], index: 3, kind: input, shape index: {}]   ;;  %s552_s4 = inlined_call_operand.vmem [shape: f32[32,1], index: 4, kind: input, shape index: {}]   ;;  %s553_s5 = inlined_call_operand.vmem [shape: f32[16,32], index: 5, kind: input, shape index: {}]   ;;  %s554_s6 = inlined_call_operand.vmem [shape: f32[16,1], index: 6, kind: input, shape index: {}]   ;;  %s555_s7 = inlined_call_operand.vmem [shape: f32[2,16], index: 7, kind: input, shape index: {}]   ;;  %s556_s8 = inlined_call_operand.vmem [shape: f32[2,1], index: 8, kind: input, shape index: {}]   ;;  %s557_s9 = inlined_call_operand.hbm [shape: f32[2,8], index: 9, kind: output, shape index: {}]  }
   0x1   :  { %v33_v0 = vld [vmem:[%s548_s0] sm:$0x7f]  ;;  %v49_v1 = vld [vmem:[%s550_s2 + $0x38] sm:$0xff]  ;;  %v47_v2 = vld [vmem:[%s550_s2 + $0x28] sm:$0xff]  ;;  %364 = vset.pattern.permute.xlu1 %v392_v3  ;;  %363 = vset.pattern.permute.xlu0 %v392_v3 }
   0x2   :  { %v34_v4 = vld [vmem:[%s549_s1] sm:$0xff]  ;;  %v39_v5 = vld [vmem:[%s549_s1 + $0x28] sm:$0xff]  ;;  %336 = vmatpush.msk.msra.mxu0 %vm115_vm0, %v33_v0  ;;  %352 = vmatpush.msk.msra.mxu3 %vm115_vm0, %v33_v0  ;;  %v45_v6 = vld [vmem:[%s550_s2 + $0x18] sm:$0xff] }
   0x3   :  { %87 = vperm.xlu0 %363, %v49_v1   ;;  %77 = vperm.xlu1 %364, %v47_v2   ;;  %v48_v7 = vld [vmem:[%s550_s2 + $0x30] sm:$0xff]  ;;  %v46_v8 = vld [vmem:[%s550_s2 + $0x20] sm:$0xff] }
   0x4   :  { %337 = vmatmul.msk.f32.vlgmr.msra.gmra.mxu0 %vm90_vm1, %v34_v4  ;;  %342 = vmatmul.msk.f32.vlgmr.msra.gmra.mxu3 %vm90_vm1, %v39_v5 }
   0x5   :  { %365 = vset.pattern.permute.xlu2 %v392_v3 }
   0x6   :  { %67 = vperm.xlu2 %365, %v45_v6  }
   0x7   :  { %14 = vsyncpa [#allocation3], 0  ;;  %v35_v9 = vld [vmem:[%s549_s1 + $0x8] sm:$0xff]  ;;  %v40_v10 = vld [vmem:[%s549_s1 + $0x30] sm:$0xff]  ;;  %vm196_vm2 = vcmask 523264   ;;  %vm256_vm3 = vcmask 261120  }
   0x8   :  { %v44_v11 = vld [vmem:[%s550_s2 + $0x10] sm:$0xff]  ;;  %v43_v12 = vld [vmem:[%s550_s2 + $0x8] sm:$0xff]  ;;  %v42_v13 = vld [vmem:[%s550_s2] sm:$0xff]  ;;  %vm295_vm4 = vcmask 130048   ;;  %s393_s19 = smov [#allocation2]   ;;  %s327_s22 = sshll.u32 %s557_s9, 4  ;;  %s328_s22 = int_to_ptr.hbm [resolvable:$true] %s327_s22 }
   0x9   :  { %v36_v14 = vld [vmem:[%s549_s1 + $0x10] sm:$0xff]  ;;  %v41_v15 = vld [vmem:[%s549_s1 + $0x38] sm:$0xff]  ;;  %v173_v18 = vld [vmem:[%s552_s4 + $0x8] sm:$0xff]  ;;  %s325_s20 = sshll.u32 %s393_s19, 4  ;;  %s326_s20 = int_to_ptr.vmem [resolvable:$true] %s325_s20 }
   0xa   :  { %v175_v16 = vld [vmem:[%s552_s4 + $0x18] sm:$0xff]  ;;  %v174_v17 = vld [vmem:[%s552_s4 + $0x10] sm:$0xff]  ;;  %v172_v20 = vld [vmem:[%s552_s4] sm:$0xff] }
   0xb   :  { %82 = vperm.xlu0 %363, %v48_v7   ;;  %72 = vperm.xlu1 %364, %v46_v8   ;;  %v37_v19 = vld [vmem:[%s549_s1 + $0x18] sm:$0xff]  ;;  %v245_v21 = vld [vmem:[%s554_s6 + $0x8] sm:$0xff]  ;;  %v244_v22 = vld [vmem:[%s554_s6] sm:$0xff] }
   0xc   :  { %338 = vmatmul.msk.f32.gmra.mxu0 %vm90_vm1, %v35_v9  ;;  %343 = vmatmul.msk.f32.gmra.mxu3 %vm90_vm1, %v40_v10  ;;  %v38_v23 = vld [vmem:[%s549_s1 + $0x20] sm:$0xff]  ;;  %v171_v58 = vld [vmem:[%s551_s3 + $0x18] sm:$0xff]  ;;  %v169_v59 = vld [vmem:[%s551_s3 + $0x8] sm:$0xff] }
   0xd   :  { %v289_v24 = vld [vmem:[%s556_s8] sm:$0x3]  ;;  %v170_v60 = vld [vmem:[%s551_s3 + $0x10] sm:$0xff] }
   0xe   :  { %62 = vperm.xlu2 %365, %v44_v11   ;;  %v168_v57 = vld [vmem:[%s551_s3] sm:$0xff] }
  0x13   :  { %57 = vperm.xlu0 %363, %v43_v12   ;;  %52 = vperm.xlu1 %364, %v42_v13   ;;  %v242_v13 = vld [vmem:[%s553_s5] sm:$0xff] }
  0x14   :  { %339 = vmatmul.msk.f32.gmra.mxu0 %vm90_vm1, %v36_v14  ;;  %344 = vmatmul.msk.f32.gmra.mxu3 %vm90_vm1, %v41_v15  ;;  %v243_v14 = vld [vmem:[%s553_s5 + $0x8] sm:$0xff] }
  0x16   :  { %193 = vperm.xlu2 %365, %v175_v16  }
  0x1b   :  { %188 = vperm.xlu0 %363, %v174_v17   ;;  %183 = vperm.xlu1 %364, %v173_v18  }
  0x1c   :  { %340 = vmatmul.msk.f32.gmra.mxu0 %vm90_vm1, %v37_v19 }
  0x1e   :  { %178 = vperm.xlu2 %365, %v172_v20  }
  0x23   :  { %253 = vperm.xlu0 %363, %v245_v21   ;;  %248 = vperm.xlu1 %364, %v244_v22  }
  0x24   :  { %341 = vmatmul.msk.f32.gmra.mxu0 %vm90_vm1, %v38_v23  ;;  %v288_v23 = vld [vmem:[%s555_s7] sm:$0x3] }
  0x26   :  { %292 = vperm.xlu2 %365, %v289_v24  }
  0x60   :  { %v68_v36 = vpop.permute.xlu2 %67 }
  0x68   :  { %v63_v46 = vpop.permute.xlu2 %62 }
  0x70   :  { %v194_v62 = vpop.permute.xlu2 %193 }
  0x75   :  { %v88_v28 = vpop.permute.xlu0 %87  ;;  %v78_v30 = vpop.permute.xlu1 %77 }
  0x78   :  { %v179_v8 = vpop.permute.xlu2 %178 }
  0x7d   :  { %v83_v32 = vpop.permute.xlu0 %82  ;;  %v73_v40 = vpop.permute.xlu1 %72 }
  0x80   :  { %v293_v24 = vpop.permute.xlu2 %292 }
  0x81   :  { %v136_v25 = vpop.f32.mrf.mxu0 }
  0x85   :  { %v58_v49 = vpop.permute.xlu0 %57  ;;  %v53_v50 = vpop.permute.xlu1 %52 }
  0x86   :  { %v137_v53 = vadd.f32 %v136_v25, %v53_v50 }
  0x87   :  { %v151_v26 = vpop.f32.mrf.mxu3 }
  0x88   :  { %v152_v38 = vadd.f32 %v151_v26, %v78_v30  ;;  %v160_v56 = vmax.f32 %v137_v53, 0.0 }
  0x89   :  { %v139_v27 = vpop.f32.mrf.mxu0 }
  0x8a   :  { %v165_v42 = vmax.f32 %v152_v38, 0.0  ;;  %v140_v51 = vadd.f32 %v139_v27, %v58_v49 }
  0x8c   :  { %v161_v55 = vmax.f32 %v140_v51, 0.0 }
  0x8d   :  { %v189_v3 = vpop.permute.xlu0 %188  ;;  %v184_v4 = vpop.permute.xlu1 %183 }
  0x8f   :  { %v154_v29 = vpop.f32.mrf.mxu3 }
  0x90   :  { %v155_v34 = vadd.f32 %v154_v29, %v83_v32 }
  0x91   :  { %v142_v31 = vpop.f32.mrf.mxu0 }
  0x92   :  { %v166_v41 = vmax.f32 %v155_v34, 0.0  ;;  %v143_v47 = vadd.f32 %v142_v31, %v63_v46 }
  0x94   :  { %v162_v54 = vmax.f32 %v143_v47, 0.0 }
  0x95   :  { %v254_v16 = vpop.permute.xlu0 %253  ;;  %v249_v17 = vpop.permute.xlu1 %248 }
  0x97   :  { %v157_v33 = vpop.f32.mrf.mxu3 }
  0x98   :  { %v158_v35 = vadd.f32 %v157_v33, %v88_v28 }
  0x99   :  { %v145_v37 = vpop.f32.mrf.mxu0 }
  0x9a   :  { %v167_v39 = vmax.f32 %v158_v35, 0.0  ;;  %v146_v44 = vadd.f32 %v145_v37, %v68_v36 }
  0x9c   :  { %217 = vmatpush.msra.mxu1 %v167_v39  ;;  %353 = vmatpush.msra.mxu2 %v167_v39  ;;  %v163_v52 = vmax.f32 %v146_v44, 0.0 }
  0x9e   :  { %218 = vmatpush.msra.mxu1 %v166_v41  ;;  %354 = vmatpush.msra.mxu2 %v166_v41 }
  0xa0   :  { %219 = vmatpush.msra.mxu1 %v165_v42  ;;  %355 = vmatpush.msra.mxu2 %v165_v42 }
  0xa1   :  { %v148_v43 = vpop.f32.mrf.mxu0 }
  0xa2   :  { %v149_v45 = vadd.f32 %v148_v43, %v73_v40 }
  0xa4   :  { %v164_v48 = vmax.f32 %v149_v45, 0.0 }
  0xa6   :  { %220 = vmatpush.msra.mxu1 %v164_v48  ;;  %356 = vmatpush.msra.mxu2 %v164_v48 }
  0xa8   :  { %221 = vmatpush.msra.mxu1 %v163_v52  ;;  %357 = vmatpush.msra.mxu2 %v163_v52 }
  0xaa   :  { %222 = vmatpush.msra.mxu1 %v162_v54  ;;  %358 = vmatpush.msra.mxu2 %v162_v54 }
  0xac   :  { %223 = vmatpush.msra.mxu1 %v161_v55  ;;  %359 = vmatpush.msra.mxu2 %v161_v55 }
  0xae   :  { %224 = vmatpush.msra.mxu1 %v160_v56  ;;  %360 = vmatpush.msra.mxu2 %v160_v56 }
  0xaf   :  { %345 = vmatmul.msk.f32.vlgmr.msra.gmra.mxu1 %vm196_vm2, %v168_v57  ;;  %348 = vmatmul.msk.f32.vlgmr.msra.gmra.mxu2 %vm196_vm2, %v171_v58 }
  0xb7   :  { %346 = vmatmul.msk.f32.gmra.mxu1 %vm196_vm2, %v169_v59 }
  0xbf   :  { %347 = vmatmul.msk.f32.gmra.mxu1 %vm196_vm2, %v170_v60 }
 0x12c   :  { %v226_v61 = vpop.f32.mrf.mxu1 }
 0x12d   :  { %v227_v9 = vadd.f32 %v226_v61, %v179_v8 }
 0x12f   :  { %v238_v12 = vmax.f32 %v227_v9, 0.0 }
 0x132   :  { %v235_v63 = vpop.f32.mrf.mxu2 }
 0x133   :  { %v236_v0 = vadd.f32 %v235_v63, %v194_v62 }
 0x134   :  { %v229_v1 = vpop.f32.mrf.mxu1 }
 0x135   :  { %v241_v2 = vmax.f32 %v236_v0, 0.0  ;;  %v230_v6 = vadd.f32 %v229_v1, %v184_v4 }
 0x137   :  { %275 = vmatpush.msrb.mxu2 %v241_v2  ;;  %v239_v11 = vmax.f32 %v230_v6, 0.0 }
 0x13c   :  { %v232_v5 = vpop.f32.mrf.mxu1 }
 0x13d   :  { %v233_v7 = vadd.f32 %v232_v5, %v189_v3 }
 0x13f   :  { %v240_v10 = vmax.f32 %v233_v7, 0.0 }
 0x141   :  { %276 = vmatpush.msrb.mxu2 %v240_v10 }
 0x143   :  { %277 = vmatpush.msrb.mxu2 %v239_v11 }
 0x145   :  { %278 = vmatpush.msrb.mxu2 %v238_v12 }
 0x146   :  { %349 = vmatmul.msk.f32.vlgmr.msrb.gmra.mxu2 %vm256_vm3, %v242_v13 }
 0x14e   :  { %350 = vmatmul.msk.f32.gmra.mxu2 %vm256_vm3, %v243_v14 }
 0x1c9   :  { %v280_v15 = vpop.f32.mrf.mxu2 }
 0x1ca   :  { %v281_v19 = vadd.f32 %v280_v15, %v249_v17 }
 0x1cc   :  { %v286_v22 = vmax.f32 %v281_v19, 0.0 }
 0x1d1   :  { %v283_v18 = vpop.f32.mrf.mxu2 }
 0x1d2   :  { %v284_v20 = vadd.f32 %v283_v18, %v254_v16 }
 0x1d4   :  { %v287_v21 = vmax.f32 %v284_v20, 0.0 }
 0x1d6   :  { %313 = vmatpush.msrb.mxu3 %v287_v21 }
 0x1d8   :  { %314 = vmatpush.msrb.mxu3 %v286_v22 }
 0x1d9   :  { %351 = vmatmul.msk.f32.vlgmr.msrb.gmra.mxu3 %vm295_vm4, %v288_v23 }
 0x25c   :  { %v316_v25 = vpop.f32.mrf.mxu3 }
 0x25d   :  { %v317_v26 = vadd.f32 %v316_v25, %v293_v24 }
 0x25f   :  { %319 = vst [vmem:[#allocation2] sm:$0x3] %v317_v26 }
 0x260   :  { %330 = dma.vmem_to_hbm [thread:$0]  %s326_s20, 32, %s328_s22, [#allocation3]  }
 0x261   :  { %390 = dma.done.wait [#allocation3], 32  }
 0x262   :  { %391 = vsyncadd [#allocation3], 4294967264 }
 0x263   :  { %335 = vsyncpa [#allocation3], 1 }

</bundles_post_ra>
